<compile_context>
chip_gen: v6e
topology: v6e:2x2x1
jax: 0.10.0
libtpu: 0.0.40
codegen_flags: <defaults>
</compile_context>

<pallas_src>
import functools

import numpy as np
import jax
import jax.numpy as jnp
from jax.experimental import pallas as pl
from jax.experimental.pallas import tpu as pltpu


def _round_up(v: int, m: int) -> int:
    return (v + m - 1) // m * m


_VMEM_CAP = None


def _vmem_capacity_bytes() -> int:
    """Per-core VMEM capacity; conservative 64 MiB (v7x) if the query fails."""
    global _VMEM_CAP
    if _VMEM_CAP is None:
        try:
            _VMEM_CAP = int(pltpu.get_tpu_info().vmem_capacity_bytes)
        except Exception:
            _VMEM_CAP = 64 * 1024 * 1024
    return _VMEM_CAP


def _make_fused_dft_mats(seq_len: int, dtype):
    """Fused, padded real-DFT matrices.

    fwd: (2*Kp, N) = [ (1/N) cos ; -(1/N) sin ]   (rows K..Kp zero)
    inv: (N, 2*Kp) = [ c_k cos | -c_k sin ]       (cols K..Kp zero)
    so that [Xr; Xi] = fwd @ x   (torch.fft.rfft, norm='forward')
    and     y        = inv @ [Yr; Yi]  (torch.fft.irfft, norm='forward').
    Kp is padded to 8 sublanes for 32-bit MXU dtypes, 16 for 16-bit (packing).
    """
    n = seq_len
    k = n // 2 + 1
    item = jnp.dtype(dtype).itemsize
    align = max(8, 32 // item)                 # 8 for f32, 16 for bf16
    kp = _round_up(k, align)

    kk = np.arange(k)[:, None]
    nn = np.arange(n)[None, :]
    theta = 2.0 * np.pi * kk * nn / n
    cos = np.cos(theta)
    sin = np.sin(theta)

    fwd = np.zeros((2 * kp, n), dtype=np.float64)
    fwd[:k, :] = cos / n                       # Xr rows (1/N folded in)
    fwd[kp:kp + k, :] = -sin / n               # Xi rows (sign + 1/N folded in)

    c = np.full((k,), 2.0)                     # Hermitian fold factor
    c[0] = 1.0
    if n % 2 == 0:
        c[-1] = 1.0
    inv = np.zeros((n, 2 * kp), dtype=np.float64)
    inv[:, :k] = cos.T * c[None, :]
    inv[:, kp:kp + k] = -(sin.T * c[None, :])

    return jnp.asarray(fwd, dtype=dtype), jnp.asarray(inv, dtype=dtype), kp


def _filter_kernel(x_ref, fwd_ref, inv_ref, wr2_ref, wi2_ref, o_ref):
    """One lane-dense (S, TH) slab: fused rfft -> complex weight -> irfft."""
    kp = wr2_ref.shape[0] // 2
    x = x_ref[...].astype(fwd_ref.dtype)                                  # (S, TH)
    # Forward real DFT: one MXU pass -> stacked [Xr; Xi], f32 accumulation.
    xf = jnp.dot(fwd_ref[...], x, preferred_element_type=jnp.float32)     # (2Kp, TH)
    # Complex weight multiply on the stacked slab (f32 on the VPU).  The
    # half-swap [Xi; Xr] is a sublane roll -> XLU slot, idle under the MXU.
    xf_sw = pltpu.roll(xf, shift=kp, axis=0)
    y = xf * wr2_ref[...] + xf_sw * wi2_ref[...]                           # (2Kp, TH)
    # Inverse real DFT: one MXU pass.
    out = jnp.dot(inv_ref[...], y.astype(inv_ref.dtype),
                  preferred_element_type=jnp.float32)                      # (S, TH)
    o_ref[...] = out.astype(o_ref.dtype)


def _vmem_need(S, Kp, TH, mxu_item, in_item, out_item, const_bufs):
    const_b = const_bufs * 2 * (2 * Kp) * S * mxu_item            # fwd + inv
    io_b = 2 * S * TH * (in_item + out_item)                      # x/out tiles (dbl-buf)
    w_b = 2 * 2 * (2 * Kp) * TH * 4                               # wr2/wi2 (dbl-buf)
    interm = (2 * Kp) * TH * (3 * 4 + mxu_item) + S * TH * (4 + mxu_item)
    return const_b + io_b + w_b + interm


def _pick_lane_tile(total, S, Kp, mxu_item, in_item, out_item, const_bufs):
    """Largest lane tile (multiple of 128, divisor of `total`) fitting VMEM."""
    budget = int(_vmem_capacity_bytes() * 0.7)
    cands = [d for d in range(128, min(total, 2048) + 1, 128) if total % d == 0]
    for t in sorted(cands, reverse=True):
        if _vmem_need(S, Kp, t, mxu_item, in_item, out_item, const_bufs) <= budget:
            return t
    # TODO(synk): for very large seq_len the S^2-sized DFT constants alone
    # exceed VMEM; a K-axis grid reduction with an f32 accumulator is needed.
    return cands[0]


def _const_spec(shape, single_buffer):
    idx = lambda *_: (0,) * len(shape)
    if single_buffer:
        # Constant block index -> single-buffer to halve constant VMEM (v7x).
        return pl.BlockSpec(shape, idx, pipeline_mode=pl.Buffered(1))
    return pl.BlockSpec(shape, idx)


@functools.partial(jax.jit, static_argnums=(2,),
                   static_argnames=("mxu_dtype", "single_buffer_consts"))
def _filter_layer_impl(x, complex_weight, seq_len, *, mxu_dtype,
                       single_buffer_consts):
    B, S_in, H = x.shape
    K = seq_len // 2 + 1
    assert complex_weight.shape == (1, K, H, 2), complex_weight.shape

    # torch.fft.rfft(n=seq_len) zero-pads / truncates the seq axis.
    if S_in < seq_len:
        x_full = jnp.pad(x, ((0, 0), (0, seq_len - S_in), (0, 0)))
    elif S_in > seq_len:
        x_full = x[:, :seq_len, :]
    else:
        x_full = x
    S = seq_len

    out_dtype = x.dtype
    in_item = jnp.dtype(x.dtype).itemsize
    out_item = jnp.dtype(out_dtype).itemsize
    mxu_item = jnp.dtype(mxu_dtype).itemsize
    const_bufs = 1 if single_buffer_consts else 2

    fwd, inv, Kp = _make_fused_dft_mats(seq_len, mxu_dtype)

    # Stacked complex weights (kept f32): y = xf*wr2 + roll(xf, Kp)*wi2
    # with xf = [Xr; Xi] reproduces Yr = Xr wr - Xi wi, Yi = Xr wi + Xi wr.
    wr = complex_weight[0, :, :, 0].astype(jnp.float32)
    wi = complex_weight[0, :, :, 1].astype(jnp.float32)
    pad_k = Kp - K
    if pad_k:
        wr = jnp.pad(wr, ((0, pad_k), (0, 0)))
        wi = jnp.pad(wi, ((0, pad_k), (0, 0)))
    wr2 = jnp.concatenate([wr, wr], axis=0)          # (2Kp, H)
    wi2 = jnp.concatenate([-wi, wi], axis=0)         # (2Kp, H)

    pick = functools.partial(_pick_lane_tile, S=S, Kp=Kp, mxu_item=mxu_item,
                             in_item=in_item, out_item=out_item,
                             const_bufs=const_bufs)

    def _vmem_limit(th):
        need = _vmem_need(S, Kp, th, mxu_item, in_item, out_item, const_bufs)
        return int(min(max(2 * need, 32 * 1024 * 1024),
                       int(_vmem_capacity_bytes() * 0.85)))

    fwd_spec = _const_spec((2 * Kp, S), single_buffer_consts)
    inv_spec = _const_spec((S, 2 * Kp), single_buffer_consts)

    # Path A only when H alone can provide a >=256-wide lane tile (v6e/v7x MXU
    # width), or when folding the batch would not widen the tile anyway.
    use_path_a = (H % 128 == 0) and (H >= 256 or B == 1)

    if use_path_a:
        TH = pick(H)
        num_h = H // TH
        # v7x has 2 TensorCores: lead the grid with the larger parallel extent.
        if num_h >= B:
            grid = (num_h, B)
            x_map = lambda j, b: (b, 0, j)
            w_map = lambda j, b: (0, j)
        else:
            grid = (B, num_h)
            x_map = lambda b, j: (b, 0, j)
            w_map = lambda b, j: (0, j)
        out_full = pl.pallas_call(
            _filter_kernel,
            out_shape=jax.ShapeDtypeStruct((B, S, H), out_dtype),
            grid_spec=pltpu.PrefetchScalarGridSpec(
                num_scalar_prefetch=0,
                grid=grid,
                in_specs=[
                    pl.BlockSpec((pl.Squeezed(), S, TH), x_map),
                    fwd_spec,
                    inv_spec,
                    pl.BlockSpec((2 * Kp, TH), w_map),
                    pl.BlockSpec((2 * Kp, TH), w_map),
                ],
                out_specs=pl.BlockSpec((pl.Squeezed(), S, TH), x_map),
            ),
            compiler_params=pltpu.CompilerParams(
                dimension_semantics=("parallel", "parallel"),
                vmem_limit_bytes=_vmem_limit(TH)),
        )(x_full, fwd, inv, wr2, wi2)
    else:
        # Path B: fold batch into the lane axis -> one wide (S, B*H) slab,
        # zero-padded to a multiple of 128 so every store is an unmasked vst.
        BH = B * H
        BHp = _round_up(BH, 128)
        xt = jnp.transpose(x_full, (1, 0, 2)).reshape(S, BH)   # col = b*H + h
        wr2_t = jnp.tile(wr2, (1, B))
        wi2_t = jnp.tile(wi2, (1, B))
        pad_l = BHp - BH
        if pad_l:
            xt = jnp.pad(xt, ((0, 0), (0, pad_l)))
            wr2_t = jnp.pad(wr2_t, ((0, 0), (0, pad_l)))
            wi2_t = jnp.pad(wi2_t, ((0, 0), (0, pad_l)))
        TH = pick(BHp)
        out_t = pl.pallas_call(
            _filter_kernel,
            out_shape=jax.ShapeDtypeStruct((S, BHp), out_dtype),
            grid_spec=pltpu.PrefetchScalarGridSpec(
                num_scalar_prefetch=0,
                grid=(BHp // TH,),
                in_specs=[
                    pl.BlockSpec((S, TH), lambda j: (0, j)),
                    fwd_spec,
                    inv_spec,
                    pl.BlockSpec((2 * Kp, TH), lambda j: (0, j)),
                    pl.BlockSpec((2 * Kp, TH), lambda j: (0, j)),
                ],
                out_specs=pl.BlockSpec((S, TH), lambda j: (0, j)),
            ),
            compiler_params=pltpu.CompilerParams(
                dimension_semantics=("parallel",),
                vmem_limit_bytes=_vmem_limit(TH)),
        )(xt, fwd, inv, wr2_t, wi2_t)
        out_full = jnp.transpose(out_t[:, :BH].reshape(S, B, H), (1, 0, 2))

    # sequence_emb_fft[:, 0:input_seq_len, :]
    out_full = out_full[:, :min(S_in, seq_len), :]
    # TODO(synk): nn.Dropout(0.1) is identity in eval mode; training-mode
    # dropout (pltpu.prng_seed / pltpu.stateful_bernoulli) is not implemented.
    return out_full


_SINGLE_BUFFER_CONSTS_OK = True


def filter_layer(x: jax.Array, complex_weight: jax.Array, seq_len: int,
                 *, mxu_dtype=jnp.bfloat16) -> jax.Array:
    """Pallas implementation of FilterLayer.forward (eval mode).

    x:              (B, S, H) float
    complex_weight: (1, seq_len//2 + 1, H, 2) float32
    mxu_dtype:      dtype of the DFT matrices fed to the MXU (bf16 default;
                    pass jnp.float32 for a numerically tight path).
    """
    global _SINGLE_BUFFER_CONSTS_OK
    if _SINGLE_BUFFER_CONSTS_OK:
        try:
            return _filter_layer_impl(x, complex_weight, seq_len,
                                      mxu_dtype=mxu_dtype,
                                      single_buffer_consts=True)
        except Exception:
            # pl.Buffered(1) on the constant DFT matrices rejected by this
            # JAX/Mosaic build -> fall back to default double-buffering.
            _SINGLE_BUFFER_CONSTS_OK = False
    return _filter_layer_impl(x, complex_weight, seq_len,
                              mxu_dtype=mxu_dtype,
                              single_buffer_consts=False)


def _reference(x: np.ndarray, complex_weight: np.ndarray, seq_len: int) -> np.ndarray:
    X = np.fft.rfft(x, n=seq_len, axis=1, norm="forward")
    W = complex_weight[..., 0] + 1j * complex_weight[..., 1]   # (1, K, H)
    Y = X * W
    y = np.fft.irfft(Y, n=seq_len, axis=1, norm="forward")
    return y[:, : min(x.shape[1], seq_len), :].astype(np.float32)


def _check(out, ref, *, tight):
    out = np.asarray(out, dtype=np.float32)
    if tight:
        np.testing.assert_allclose(out, ref, rtol=1e-4, atol=1e-5)
    else:
        rel = np.linalg.norm(out - ref) / max(np.linalg.norm(ref), 1e-6)
        assert rel < 3e-2, f"bf16 relative L2 error too large: {rel}"


if __name__ == "__main__":
    key = jax.random.PRNGKey(0)
    cases = [
        (2, 8, 32),    # B*H folded + lane-padded to 128      (Path B)
        (2, 8, 128),   # B*H folded into a 256-wide lane slab (Path B)
        (2, 8, 256),   # lane-aligned H, 2-D (tiles, batch) grid (Path A)
    ]
    for idx, (B, S, H) in enumerate(cases):
        key, k1, k2 = jax.random.split(key, 3)
        x = jax.random.normal(k1, (B, S, H), dtype=jnp.float32)
        w = jax.random.normal(k2, (1, S // 2 + 1, H, 2), dtype=jnp.float32)
        ref = _reference(np.asarray(x), np.asarray(w), S)

        # Default (bf16 MXU) path: looser, norm-relative check.
        out_bf16 = jax.block_until_ready(filter_layer(x, w, S))
        _check(out_bf16, ref, tight=False)

        # f32 MXU path: tight elementwise check (validates the DFT math).
        if idx != 1:
            out_f32 = jax.block_until_ready(
                filter_layer(x, w, S, mxu_dtype=jnp.float32))
            _check(out_f32, ref, tight=True)

    print("KERNEL_OK")
</pallas_src>

<mosaic_0001>
module attributes {stable_mosaic.version = 11 : i64} {
  func.func @_filter_kernel(%arg0: i32, %arg1: memref<8x128xf32, #tpu.memory_space<vmem>>, %arg2: memref<32x8xbf16, #tpu.memory_space<vmem>>, %arg3: memref<8x32xbf16, #tpu.memory_space<vmem>>, %arg4: memref<32x128xf32, #tpu.memory_space<vmem>>, %arg5: memref<32x128xf32, #tpu.memory_space<vmem>>, %arg6: memref<8x128xf32, #tpu.memory_space<vmem>>) attributes {dimension_semantics = [#tpu.dimension_semantics<parallel>], iteration_bounds = array<i64: 1>, scalar_prefetch = 0 : i64, scratch_operands = 0 : i64, tpu.core_type = #tpu.core_type<tc>, window_params = [{transform_indices = @transform_0, window_bounds = array<i64: 8, 128>}, {pipeline_mode = #tpu.pipeline_mode<synchronous>, transform_indices = @transform_1, window_bounds = array<i64: 32, 8>}, {pipeline_mode = #tpu.pipeline_mode<synchronous>, transform_indices = @transform_2, window_bounds = array<i64: 8, 32>}, {transform_indices = @transform_3, window_bounds = array<i64: 32, 128>}, {transform_indices = @transform_4, window_bounds = array<i64: 32, 128>}, {transform_indices = @transform_5, window_bounds = array<i64: 8, 128>}]} {
    %c0 = arith.constant 0 : index
    %c0_0 = arith.constant 0 : index
    %0 = vector.load %arg1[%c0, %c0_0] : memref<8x128xf32, #tpu.memory_space<vmem>>, vector<8x128xf32>
    %1 = arith.truncf %0 : vector<8x128xf32> to vector<8x128xbf16>
    %c0_1 = arith.constant 0 : index
    %c0_2 = arith.constant 0 : index
    %2 = vector.load %arg2[%c0_1, %c0_2] : memref<32x8xbf16, #tpu.memory_space<vmem>>, vector<32x8xbf16>
    %cst = arith.constant dense<0.000000e+00> : vector<32x128xf32>
    %3 = tpu.matmul %2, %1, %cst {dimension_numbers = #tpu.dot_dimension_numbers<[1], [0], [0], [1], [0, 0, 1, 1], [], []>} : vector<32x8xbf16>, vector<8x128xbf16>, vector<32x128xf32> -> vector<32x128xf32>
    %c16_i32 = arith.constant 16 : i32
    %4 = tpu.dynamic_rotate %3 by %c16_i32 dim 0 : vector<32x128xf32>, i32 -> vector<32x128xf32>
    %c0_3 = arith.constant 0 : index
    %c0_4 = arith.constant 0 : index
    %5 = vector.load %arg4[%c0_3, %c0_4] : memref<32x128xf32, #tpu.memory_space<vmem>>, vector<32x128xf32>
    %6 = arith.mulf %3, %5 : vector<32x128xf32>
    %c0_5 = arith.constant 0 : index
    %c0_6 = arith.constant 0 : index
    %7 = vector.load %arg5[%c0_5, %c0_6] : memref<32x128xf32, #tpu.memory_space<vmem>>, vector<32x128xf32>
    %8 = arith.mulf %4, %7 : vector<32x128xf32>
    %9 = arith.addf %6, %8 : vector<32x128xf32>
    %c0_7 = arith.constant 0 : index
    %c0_8 = arith.constant 0 : index
    %10 = vector.load %arg3[%c0_7, %c0_8] : memref<8x32xbf16, #tpu.memory_space<vmem>>, vector<8x32xbf16>
    %11 = arith.truncf %9 : vector<32x128xf32> to vector<32x128xbf16>
    %cst_9 = arith.constant dense<0.000000e+00> : vector<8x128xf32>
    %12 = tpu.matmul %10, %11, %cst_9 {dimension_numbers = #tpu.dot_dimension_numbers<[1], [0], [0], [1], [0, 0, 1, 1], [], []>} : vector<8x32xbf16>, vector<32x128xbf16>, vector<8x128xf32> -> vector<8x128xf32>
    %c0_10 = arith.constant 0 : index
    %c0_11 = arith.constant 0 : index
    %13 = vector.load %arg6[%c0_10, %c0_11] : memref<8x128xf32, #tpu.memory_space<vmem>>, vector<8x128xf32>
    tpu.vector_store %arg6[%c0_10, %c0_11], %12 {strides = array<i32>} : memref<8x128xf32, #tpu.memory_space<vmem>>, vector<8x128xf32>,
    return
  }
  func.func @transform_0(%arg0: i32) -> (i32, i32) {
    %c0_i32 = arith.constant 0 : i32
    %c0_i32_0 = arith.constant 0 : i32
    return %c0_i32, %arg0 : i32, i32
  }
  func.func @transform_1(%arg0: i32) -> (i32, i32) {
    %c0_i32 = arith.constant 0 : i32
    %c0_i32_0 = arith.constant 0 : i32
    %c0_i32_1 = arith.constant 0 : i32
    return %c0_i32, %c0_i32_0 : i32, i32
  }
  func.func @transform_2(%arg0: i32) -> (i32, i32) {
    %c0_i32 = arith.constant 0 : i32
    %c0_i32_0 = arith.constant 0 : i32
    %c0_i32_1 = arith.constant 0 : i32
    return %c0_i32, %c0_i32_0 : i32, i32
  }
  func.func @transform_3(%arg0: i32) -> (i32, i32) {
    %c0_i32 = arith.constant 0 : i32
    %c0_i32_0 = arith.constant 0 : i32
    return %c0_i32, %arg0 : i32, i32
  }
  func.func @transform_4(%arg0: i32) -> (i32, i32) {
    %c0_i32 = arith.constant 0 : i32
    %c0_i32_0 = arith.constant 0 : i32
    return %c0_i32, %arg0 : i32, i32
  }
  func.func @transform_5(%arg0: i32) -> (i32, i32) {
    %c0_i32 = arith.constant 0 : i32
    %c0_i32_0 = arith.constant 0 : i32
    return %c0_i32, %arg0 : i32, i32
  }
}

module attributes {stable_mosaic.version = 11 : i64} {
  func.func @_filter_kernel(%arg0: i32, %arg1: memref<8x128xf32, #tpu.memory_space<vmem>>, %arg2: memref<32x8xbf16, #tpu.memory_space<vmem>>, %arg3: memref<8x32xbf16, #tpu.memory_space<vmem>>, %arg4: memref<32x128xf32, #tpu.memory_space<vmem>>, %arg5: memref<32x128xf32, #tpu.memory_space<vmem>>, %arg6: memref<8x128xf32, #tpu.memory_space<vmem>>) attributes {dimension_semantics = [#tpu.dimension_semantics<parallel>], iteration_bounds = array<i64: 1>, scalar_prefetch = 0 : i64, scratch_operands = 0 : i64, tpu.core_type = #tpu.core_type<tc>, window_params = [{transform_indices = @transform_0, window_bounds = array<i64: 8, 128>}, {pipeline_mode = #tpu.pipeline_mode<synchronous>, transform_indices = @transform_1, window_bounds = array<i64: 32, 8>}, {pipeline_mode = #tpu.pipeline_mode<synchronous>, transform_indices = @transform_2, window_bounds = array<i64: 8, 32>}, {transform_indices = @transform_3, window_bounds = array<i64: 32, 128>}, {transform_indices = @transform_4, window_bounds = array<i64: 32, 128>}, {transform_indices = @transform_5, window_bounds = array<i64: 8, 128>}]} {
    %c0 = arith.constant 0 : index
    %c0_0 = arith.constant 0 : index
    %0 = vector.load %arg1[%c0, %c0_0] : memref<8x128xf32, #tpu.memory_space<vmem>>, vector<8x128xf32>
    %1 = arith.truncf %0 : vector<8x128xf32> to vector<8x128xbf16>
    %c0_1 = arith.constant 0 : index
    %c0_2 = arith.constant 0 : index
    %2 = vector.load %arg2[%c0_1, %c0_2] : memref<32x8xbf16, #tpu.memory_space<vmem>>, vector<32x8xbf16>
    %cst = arith.constant dense<0.000000e+00> : vector<32x128xf32>
    %3 = tpu.matmul %2, %1, %cst {dimension_numbers = #tpu.dot_dimension_numbers<[1], [0], [0], [1], [0, 0, 1, 1], [], []>} : vector<32x8xbf16>, vector<8x128xbf16>, vector<32x128xf32> -> vector<32x128xf32>
    %c16_i32 = arith.constant 16 : i32
    %4 = tpu.dynamic_rotate %3 by %c16_i32 dim 0 : vector<32x128xf32>, i32 -> vector<32x128xf32>
    %c0_3 = arith.constant 0 : index
    %c0_4 = arith.constant 0 : index
    %5 = vector.load %arg4[%c0_3, %c0_4] : memref<32x128xf32, #tpu.memory_space<vmem>>, vector<32x128xf32>
    %6 = arith.mulf %3, %5 : vector<32x128xf32>
    %c0_5 = arith.constant 0 : index
    %c0_6 = arith.constant 0 : index
    %7 = vector.load %arg5[%c0_5, %c0_6] : memref<32x128xf32, #tpu.memory_space<vmem>>, vector<32x128xf32>
    %8 = arith.mulf %4, %7 : vector<32x128xf32>
    %9 = arith.addf %6, %8 : vector<32x128xf32>
    %c0_7 = arith.constant 0 : index
    %c0_8 = arith.constant 0 : index
    %10 = vector.load %arg3[%c0_7, %c0_8] : memref<8x32xbf16, #tpu.memory_space<vmem>>, vector<8x32xbf16>
    %11 = arith.truncf %9 : vector<32x128xf32> to vector<32x128xbf16>
    %cst_9 = arith.constant dense<0.000000e+00> : vector<8x128xf32>
    %12 = tpu.matmul %10, %11, %cst_9 {dimension_numbers = #tpu.dot_dimension_numbers<[1], [0], [0], [1], [0, 0, 1, 1], [], []>} : vector<8x32xbf16>, vector<32x128xbf16>, vector<8x128xf32> -> vector<8x128xf32>
    %c0_10 = arith.constant 0 : index
    %c0_11 = arith.constant 0 : index
    %13 = vector.load %arg6[%c0_10, %c0_11] : memref<8x128xf32, #tpu.memory_space<vmem>>, vector<8x128xf32>
    tpu.vector_store %arg6[%c0_10, %c0_11], %12 {strides = array<i32>} : memref<8x128xf32, #tpu.memory_space<vmem>>, vector<8x128xf32>,
    return
  }
  func.func @transform_0(%arg0: i32) -> (i32, i32) {
    %c0_i32 = arith.constant 0 : i32
    %c0_i32_0 = arith.constant 0 : i32
    return %c0_i32, %arg0 : i32, i32
  }
  func.func @transform_1(%arg0: i32) -> (i32, i32) {
    %c0_i32 = arith.constant 0 : i32
    %c0_i32_0 = arith.constant 0 : i32
    %c0_i32_1 = arith.constant 0 : i32
    return %c0_i32, %c0_i32_0 : i32, i32
  }
  func.func @transform_2(%arg0: i32) -> (i32, i32) {
    %c0_i32 = arith.constant 0 : i32
    %c0_i32_0 = arith.constant 0 : i32
    %c0_i32_1 = arith.constant 0 : i32
    return %c0_i32, %c0_i32_0 : i32, i32
  }
  func.func @transform_3(%arg0: i32) -> (i32, i32) {
    %c0_i32 = arith.constant 0 : i32
    %c0_i32_0 = arith.constant 0 : i32
    return %c0_i32, %arg0 : i32, i32
  }
  func.func @transform_4(%arg0: i32) -> (i32, i32) {
    %c0_i32 = arith.constant 0 : i32
    %c0_i32_0 = arith.constant 0 : i32
    return %c0_i32, %arg0 : i32, i32
  }
  func.func @transform_5(%arg0: i32) -> (i32, i32) {
    %c0_i32 = arith.constant 0 : i32
    %c0_i32_0 = arith.constant 0 : i32
    return %c0_i32, %arg0 : i32, i32
  }
}

</mosaic_0001>

<bundles_post_ra>
// kernel: tile.19
= control target key start
LH: loop header
LB: loop body
LE: loop exit
PB: predicated region body
PF: predicated region fallthrough
CT: control target
= control target key end

     0   :  { %vm163_vm0 = vcmask 1047556   ;;  %s305_s10 = smov 32   ;;  %vm165_vm1 = vcmask 261120   ;;  %vm202_vm2 = vcmask 523520   ;;  %s452_s0 = inlined_call_operand.vmem [shape: f32[32,2,32], index: 0, kind: input, shape index: {}]   ;;  %s453_s1 = inlined_call_operand.vmem [shape: f32[32,64], index: 1, kind: output, shape index: {}]  }
   0x1   :  { %v291_v0 = vld [vmem:[%s452_s0 + $0xe] sm:$0x3]  ;;  %v292_v1 = vld [vmem:[%s452_s0 + $0xc] sm:$0x3]  ;;  %v293_v2 = vld [vmem:[%s452_s0 + $0xa] sm:$0x3] }
   0x2   :  { %129 = vst [vmem:[#allocation0 + $0x38] sm:$0x3] %v291_v0  ;;  %134 = vst [vmem:[#allocation0 + $0x30] sm:$0x3] %v292_v1  ;;  %v294_v3 = vld [vmem:[%s452_s0 + $0x8] sm:$0x3] }
   0x3   :  { %139 = vst [vmem:[#allocation0 + $0x28] sm:$0x3] %v293_v2  ;;  %v295_v4 = vld [vmem:[%s452_s0 + $0x6] sm:$0x3]  ;;  %v296_v5 = vld [vmem:[%s452_s0 + $0x4] sm:$0x3] }
   0x4   :  { %144 = vst [vmem:[#allocation0 + $0x20] sm:$0x3] %v294_v3  ;;  %149 = vst [vmem:[#allocation0 + $0x18] sm:$0x3] %v295_v4  ;;  %v297_v6 = vld [vmem:[%s452_s0 + $0x2] sm:$0x3] }
   0x5   :  { %154 = vst [vmem:[#allocation0 + $0x10] sm:$0x3] %v296_v5  ;;  %v159_v7 = vld [vmem:[%s452_s0] sm:$0x3]  ;;  %158 = vst [vmem:[#allocation0 + $0x8] sm:$0x3] %v297_v6 }
   0x6   :  { %160 = vst [vmem:[#allocation0] sm:$0x3] %v159_v7  ;;  %v275_v8 = vld [vmem:[%s452_s0 + $0x2e] sm:$0x3]  ;;  %v276_v9 = vld [vmem:[%s452_s0 + $0x2c] sm:$0x3] }
   0x7   :  { %v277_v10 = vld [vmem:[%s452_s0 + $0x2a] sm:$0x3]  ;;  %49 = vst [vmem:[#allocation0 + $0xb8] sm:$0x3] %v275_v8  ;;  %54 = vst [vmem:[#allocation0 + $0xb0] sm:$0x3] %v276_v9 }
   0x8   :  { %59 = vst [vmem:[#allocation0 + $0xa8] sm:$0x3] %v277_v10  ;;  %v278_v11 = vld [vmem:[%s452_s0 + $0x28] sm:$0x3]  ;;  %v279_v12 = vld [vmem:[%s452_s0 + $0x26] sm:$0x3] }
   0x9   :  { %v280_v13 = vld [vmem:[%s452_s0 + $0x24] sm:$0x3]  ;;  %64 = vst [vmem:[#allocation0 + $0xa0] sm:$0x3] %v278_v11  ;;  %69 = vst [vmem:[#allocation0 + $0x98] sm:$0x3] %v279_v12 }
   0xa   :  { %74 = vst [vmem:[#allocation0 + $0x90] sm:$0x3] %v280_v13  ;;  %v281_v14 = vld [vmem:[%s452_s0 + $0x22] sm:$0x3]  ;;  %v282_v15 = vld [vmem:[%s452_s0 + $0x20] sm:$0x3] }
   0xb   :  { %v283_v16 = vld [vmem:[%s452_s0 + $0x1e] sm:$0x3]  ;;  %79 = vst [vmem:[#allocation0 + $0x88] sm:$0x3] %v281_v14  ;;  %84 = vst [vmem:[#allocation0 + $0x80] sm:$0x3] %v282_v15 }
   0xc   :  { %89 = vst [vmem:[#allocation0 + $0x78] sm:$0x3] %v283_v16  ;;  %v284_v17 = vld [vmem:[%s452_s0 + $0x1c] sm:$0x3]  ;;  %v285_v18 = vld [vmem:[%s452_s0 + $0x1a] sm:$0x3] }
   0xd   :  { %v286_v19 = vld [vmem:[%s452_s0 + $0x18] sm:$0x3]  ;;  %94 = vst [vmem:[#allocation0 + $0x70] sm:$0x3] %v284_v17  ;;  %99 = vst [vmem:[#allocation0 + $0x68] sm:$0x3] %v285_v18 }
   0xe   :  { %104 = vst [vmem:[#allocation0 + $0x60] sm:$0x3] %v286_v19  ;;  %v287_v20 = vld [vmem:[%s452_s0 + $0x16] sm:$0x3]  ;;  %v288_v21 = vld [vmem:[%s452_s0 + $0x14] sm:$0x3] }
   0xf   :  { %v289_v22 = vld [vmem:[%s452_s0 + $0x12] sm:$0x3]  ;;  %109 = vst [vmem:[#allocation0 + $0x58] sm:$0x3] %v287_v20  ;;  %114 = vst [vmem:[#allocation0 + $0x50] sm:$0x3] %v288_v21 }
  0x10   :  { %119 = vst [vmem:[#allocation0 + $0x48] sm:$0x3] %v289_v22  ;;  %v290_v23 = vld [vmem:[%s452_s0 + $0x10] sm:$0x3]  ;;  %v267_v24 = vld [vmem:[%s452_s0 + $0x3e] sm:$0x3] }
  0x11   :  { %v268_v25 = vld [vmem:[%s452_s0 + $0x3c] sm:$0x3]  ;;  %v197_v26 = vld [vmem:[#allocation0 + $0x1] ss:$8 sm:$0xf0]  }
  0x12   :  { %124 = vst [vmem:[#allocation0 + $0x40] sm:$0x3] %v290_v23  ;;  %9 = vst [vmem:[#allocation0 + $0xf8] sm:$0x3] %v267_v24  ;;  %v269_v27 = vld [vmem:[%s452_s0 + $0x3a] sm:$0x3] }
  0x13   :  { %14 = vst [vmem:[#allocation0 + $0xf0] sm:$0x3] %v268_v25  ;;  %v195_v28 = vld [vmem:[#allocation0 + $0x1] ss:$8 sm:$0xf]  }
  0x14   :  { %19 = vst [vmem:[#allocation0 + $0xe8] sm:$0x3] %v269_v27  ;;  %v270_v29 = vld [vmem:[%s452_s0 + $0x38] sm:$0x3]  ;;  %v199_v30 = vsel %vm163_vm0, %v197_v26, %v195_v28  ;;  %v271_v31 = vld [vmem:[%s452_s0 + $0x36] sm:$0x3] }
  0x15   :  { %24 = vst [vmem:[#allocation0 + $0xe0] sm:$0x3] %v270_v29  ;;  %v272_v32 = vld [vmem:[%s452_s0 + $0x34] sm:$0x3]  ;;  %v273_v33 = vld [vmem:[%s452_s0 + $0x32] sm:$0x3]  ;;  %200 = vrot.lane.b32.xlu0 %v199_v30, %s305_s10 }
  0x16   :  { %v218_v34 = vld [vmem:[#allocation0 + $0x81] ss:$8 sm:$0xf0]   ;;  %29 = vst [vmem:[#allocation0 + $0xd8] sm:$0x3] %v271_v31 }
  0x17   :  { %34 = vst [vmem:[#allocation0 + $0xd0] sm:$0x3] %v272_v32  ;;  %39 = vst [vmem:[#allocation0 + $0xc8] sm:$0x3] %v273_v33  ;;  %v274_v35 = vld [vmem:[%s452_s0 + $0x30] sm:$0x3] }
  0x18   :  { %v216_v36 = vld [vmem:[#allocation0 + $0x81] ss:$8 sm:$0xf]   ;;  %44 = vst [vmem:[#allocation0 + $0xc0] sm:$0x3] %v274_v35 }
  0x19   :  { %v161_v37 = vld [vmem:[#allocation0] ss:$8 sm:$0xf]   ;;  %v220_v38 = vsel %vm163_vm0, %v218_v34, %v216_v36  ;;  %v207_v39 = vld [vmem:[#allocation0 + $0x41] ss:$8 sm:$0xf0]  }
  0x1a   :  { %v162_v40 = vld [vmem:[#allocation0] ss:$8 sm:$0xf0]   ;;  %221 = vrot.lane.b32.xlu1 %v220_v38, %s305_s10  ;;  %v205_v44 = vld [vmem:[#allocation0 + $0x41] ss:$8 sm:$0xf]  }
  0x1b   :  { %v164_v41 = vsel %vm163_vm0, %v162_v40, %v161_v37  ;;  %v177_v42 = vld [vmem:[#allocation0 + $0x80] ss:$8 sm:$0xf]   ;;  %v209_v47 = vsel %vm163_vm0, %v207_v39, %v205_v44 }
  0x1c   :  { %v179_v43 = vld [vmem:[#allocation0 + $0x80] ss:$8 sm:$0xf0]   ;;  %166 = vst.msk [vmem:[%s453_s1] sm:$0xff] %vm165_vm1, %v164_v41   ;;  %210 = vrot.lane.b32.xlu0 %v209_v47, %s305_s10 }
  0x1d   :  { %v181_v45 = vsel %vm163_vm0, %v179_v43, %v177_v42  ;;  %v168_v46 = vld [vmem:[#allocation0 + $0x40] ss:$8 sm:$0xf]   ;;  %v229_v49 = vld [vmem:[#allocation0 + $0xc1] ss:$8 sm:$0xf0]  }
  0x1e   :  { %299 = vst.msk [vmem:[%s453_s1 + $0x10] sm:$0xff] %vm165_vm1, %v181_v45   ;;  %v170_v48 = vld [vmem:[#allocation0 + $0x40] ss:$8 sm:$0xf0]  }
  0x1f   :  { %v172_v50 = vsel %vm163_vm0, %v170_v48, %v168_v46  ;;  %v188_v51 = vld [vmem:[#allocation0 + $0xc0] ss:$8 sm:$0xf0]   ;;  %v227_v52 = vld [vmem:[#allocation0 + $0xc1] ss:$8 sm:$0xf]  }
  0x20   :  { %298 = vst.msk [vmem:[%s453_s1 + $0x8] sm:$0xff] %vm165_vm1, %v172_v50   ;;  %v186_v53 = vld [vmem:[#allocation0 + $0xc0] ss:$8 sm:$0xf]   ;;  %v231_v54 = vsel %vm163_vm0, %v229_v49, %v227_v52 }
  0x21   :  { %v190_v55 = vsel %vm163_vm0, %v188_v51, %v186_v53  ;;  %232 = vrot.lane.b32.xlu1 %v231_v54, %s305_s10 }
  0x22   :  { %300 = vst.msk [vmem:[%s453_s1 + $0x18] sm:$0xff] %vm165_vm1, %v190_v55  }
  0x87   :  { %v201_v56 = vpop.permute.xlu0 %200  }
  0x88   :  { %203 = vst.msk [vmem:[%s453_s1] sm:$0xff] %vm202_vm2, %v201_v56  }
  0x8c   :  { %v222_v57 = vpop.permute.xlu1 %221  }
  0x8d   :  { %302 = vst.msk [vmem:[%s453_s1 + $0x10] sm:$0xff] %vm202_vm2, %v222_v57  }
  0x8e   :  { %v211_v58 = vpop.permute.xlu0 %210  }
  0x8f   :  { %301 = vst.msk [vmem:[%s453_s1 + $0x8] sm:$0xff] %vm202_vm2, %v211_v58  }
  0x93   :  { %v233_v59 = vpop.permute.xlu1 %232  }
  0x94   :  { %303 = vst.msk [vmem:[%s453_s1 + $0x18] sm:$0xff] %vm202_vm2, %v233_v59  }

// kernel: _filter_layer_impl.1
= control target key start
LH: loop header
LB: loop body
LE: loop exit
PB: predicated region body
PF: predicated region fallthrough
CT: control target
= control target key end

     0   :  { %vm44_vm0 = vcmask 1043456   ;;  %vm37_vm1 = vcmask 64512   ;;  %v199_v5 = vmov 0.0   ;;  %vm200_vm2 = vmmov 0   ;;  %s270_s0 = inlined_call_operand.vmem [shape: f32[8,128], index: 0, kind: input, shape index: {}]   ;;  %s271_s1 = inlined_call_operand.vmem [shape: bf16[32,8], index: 1, kind: input, shape index: {}]   ;;  %s272_s3 = inlined_call_operand.vmem [shape: f32[32,128], index: 3, kind: input, shape index: {}]   ;;  %s273_s4 = inlined_call_operand.vmem [shape: f32[32,128], index: 4, kind: input, shape index: {}]   ;;  %s274_s2 = inlined_call_operand.vmem [shape: bf16[8,32], index: 2, kind: input, shape index: {}]   ;;  %s275_s5 = inlined_call_operand.vmem [shape: f32[8,128], index: 5, kind: output, shape index: {}]  }
   0x1   :  { %v21_v0 = vld [vmem:[%s270_s0] sm:$0xff]  ;;  %v198_v4 = vld [vmem:[%s271_s1 + $0x8] sm:$0xff]   ;;  %186 = vmatprep.subr.bf16.mxu1 %v199_v5  ;;  %190 = vmatprep.mubr.msk.bf16.mxu1 %vm200_vm2, %v199_v5  ;;  %v107_v8 = vld [vmem:[%s273_s4 + $0x10] sm:$0xff]  ;;  %vm120_vm3 = vcmask 261120  }
   0x2   :  { %v22_v1 = vpack.c.bf16 %v21_v0, %v21_v0  ;;  %v197_v2 = vld [vmem:[%s271_s1] sm:$0xff]   ;;  %v99_v9 = vld [vmem:[%s272_s3 + $0x10] sm:$0xff]  ;;  %v100_v11 = vld [vmem:[%s272_s3 + $0x18] sm:$0xff] }
   0x3   :  { %182 = vmatprep.mubr.msk.bf16.mxu0 %vm37_vm1, %v197_v2  ;;  %v98_v12 = vld [vmem:[%s272_s3 + $0x8] sm:$0xff]  ;;  %v108_v13 = vld [vmem:[%s273_s4 + $0x18] sm:$0xff]  ;;  %v97_v15 = vld [vmem:[%s272_s3] sm:$0xff] }
   0x4   :  { %194 = vmatprep.subr.msk.bf16.mxu0 %vm44_vm0, %v22_v1  ;;  %v46_v3 = vsel %vm44_vm0, %v22_v1, 0  ;;  %v106_v16 = vld [vmem:[%s273_s4 + $0x8] sm:$0xff]  ;;  %v105_v22 = vld [vmem:[%s273_s4] sm:$0xff] }
   0x5   :  { %181 = vmatpush3.bf16.msra.mxu0 %v46_v3  ;;  %v117_v32 = vld [vmem:[%s274_s2] sm:$0xf] }
   0x8   :  { %183 = vmatmul.mubr.msk.bf16.vlgmr.msra.gmra.mxu0 %vm37_vm1, %v198_v4 }
  0xc8   :  { %v184_v6 = vpop.f32.mrf.mxu0 }
  0xc9   :  { %v103_v18 = vmul.f32 %v184_v6, %v99_v9  ;;  %v109_v27 = vmul.f32 %v184_v6, %v105_v22 }
  0xca   :  { %v82_v7 = vpop.f32.mrf.mxu0 }
  0xcb   :  { %v111_v14 = vmul.f32 %v107_v8, %v82_v7  ;;  %v101_v23 = vmul.f32 %v97_v15, %v82_v7 }
  0xcc   :  { %v185_v10 = vpop.f32.mrf.mxu0 }
  0xcd   :  { %v104_v19 = vmul.f32 %v185_v10, %v100_v11  ;;  %v110_v24 = vmul.f32 %v185_v10, %v106_v16  ;;  %v115_v26 = vadd.f32 %v111_v14, %v103_v18  ;;  %v113_v30 = vadd.f32 %v109_v27, %v101_v23 }
  0xce   :  { %v85_v17 = vpop.f32.mrf.mxu0 }
  0xcf   :  { %v102_v20 = vmul.f32 %v98_v12, %v85_v17  ;;  %v112_v21 = vmul.f32 %v108_v13, %v85_v17 }
  0xd1   :  { %v116_v25 = vadd.f32 %v112_v21, %v104_v19  ;;  %v114_v28 = vadd.f32 %v110_v24, %v102_v20 }
  0xd3   :  { %v119_v29 = vpack.c.bf16 %v116_v25, %v115_v26  ;;  %v118_v31 = vpack.c.bf16 %v114_v28, %v113_v30 }
  0xd5   :  { %187 = vmatpush3.bf16.msra.mxu1 %v119_v29 }
  0xd6   :  { %188 = vmatprep.subr.bf16.mxu1 %v199_v5 }
  0xd9   :  { %189 = vmatpush3.bf16.msra.mxu1 %v118_v31 }
  0xdc   :  { %191 = vmatmul.mubr.msk.bf16.vlgmr.msra.gmra.mxu1 %vm120_vm3, %v117_v32 }
 0x19c   :  { %v158_v33 = vpop.f32.mrf.mxu1 }
 0x19d   :  { %164 = vst [vmem:[%s275_s5] sm:$0xff] %v158_v33 }
 0x19e   :  { %v192_v34 = vpop.f32.mrf.mxu1 }
 0x1a0   :  { %v161_v35 = vpop.f32.mrf.mxu1 }
 0x1a2   :  { %v193_v36 = vpop.f32.mrf.mxu1 }

// kernel: tile.19
= control target key start
LH: loop header
LB: loop body
LE: loop exit
PB: predicated region body
PF: predicated region fallthrough
CT: control target
= control target key end

     0   :  { %vm163_vm0 = vcmask 1047556   ;;  %s305_s10 = smov 32   ;;  %vm165_vm1 = vcmask 261120   ;;  %vm202_vm2 = vcmask 523520   ;;  %s452_s0 = inlined_call_operand.vmem [shape: f32[32,2,32], index: 0, kind: input, shape index: {}]   ;;  %s453_s1 = inlined_call_operand.vmem [shape: f32[32,64], index: 1, kind: output, shape index: {}]  }
   0x1   :  { %v291_v0 = vld [vmem:[%s452_s0 + $0xe] sm:$0x3]  ;;  %v292_v1 = vld [vmem:[%s452_s0 + $0xc] sm:$0x3]  ;;  %v293_v2 = vld [vmem:[%s452_s0 + $0xa] sm:$0x3] }
   0x2   :  { %129 = vst [vmem:[#allocation0 + $0x38] sm:$0x3] %v291_v0  ;;  %134 = vst [vmem:[#allocation0 + $0x30] sm:$0x3] %v292_v1  ;;  %v294_v3 = vld [vmem:[%s452_s0 + $0x8] sm:$0x3] }
   0x3   :  { %139 = vst [vmem:[#allocation0 + $0x28] sm:$0x3] %v293_v2  ;;  %v295_v4 = vld [vmem:[%s452_s0 + $0x6] sm:$0x3]  ;;  %v296_v5 = vld [vmem:[%s452_s0 + $0x4] sm:$0x3] }
   0x4   :  { %144 = vst [vmem:[#allocation0 + $0x20] sm:$0x3] %v294_v3  ;;  %149 = vst [vmem:[#allocation0 + $0x18] sm:$0x3] %v295_v4  ;;  %v297_v6 = vld [vmem:[%s452_s0 + $0x2] sm:$0x3] }
   0x5   :  { %154 = vst [vmem:[#allocation0 + $0x10] sm:$0x3] %v296_v5  ;;  %v159_v7 = vld [vmem:[%s452_s0] sm:$0x3]  ;;  %158 = vst [vmem:[#allocation0 + $0x8] sm:$0x3] %v297_v6 }
   0x6   :  { %160 = vst [vmem:[#allocation0] sm:$0x3] %v159_v7  ;;  %v275_v8 = vld [vmem:[%s452_s0 + $0x2e] sm:$0x3]  ;;  %v276_v9 = vld [vmem:[%s452_s0 + $0x2c] sm:$0x3] }
   0x7   :  { %v277_v10 = vld [vmem:[%s452_s0 + $0x2a] sm:$0x3]  ;;  %49 = vst [vmem:[#allocation0 + $0xb8] sm:$0x3] %v275_v8  ;;  %54 = vst [vmem:[#allocation0 + $0xb0] sm:$0x3] %v276_v9 }
   0x8   :  { %59 = vst [vmem:[#allocation0 + $0xa8] sm:$0x3] %v277_v10  ;;  %v278_v11 = vld [vmem:[%s452_s0 + $0x28] sm:$0x3]  ;;  %v279_v12 = vld [vmem:[%s452_s0 + $0x26] sm:$0x3] }
   0x9   :  { %v280_v13 = vld [vmem:[%s452_s0 + $0x24] sm:$0x3]  ;;  %64 = vst [vmem:[#allocation0 + $0xa0] sm:$0x3] %v278_v11  ;;  %69 = vst [vmem:[#allocation0 + $0x98] sm:$0x3] %v279_v12 }
   0xa   :  { %74 = vst [vmem:[#allocation0 + $0x90] sm:$0x3] %v280_v13  ;;  %v281_v14 = vld [vmem:[%s452_s0 + $0x22] sm:$0x3]  ;;  %v282_v15 = vld [vmem:[%s452_s0 + $0x20] sm:$0x3] }
   0xb   :  { %v283_v16 = vld [vmem:[%s452_s0 + $0x1e] sm:$0x3]  ;;  %79 = vst [vmem:[#allocation0 + $0x88] sm:$0x3] %v281_v14  ;;  %84 = vst [vmem:[#allocation0 + $0x80] sm:$0x3] %v282_v15 }
   0xc   :  { %89 = vst [vmem:[#allocation0 + $0x78] sm:$0x3] %v283_v16  ;;  %v284_v17 = vld [vmem:[%s452_s0 + $0x1c] sm:$0x3]  ;;  %v285_v18 = vld [vmem:[%s452_s0 + $0x1a] sm:$0x3] }
   0xd   :  { %v286_v19 = vld [vmem:[%s452_s0 + $0x18] sm:$0x3]  ;;  %94 = vst [vmem:[#allocation0 + $0x70] sm:$0x3] %v284_v17  ;;  %99 = vst [vmem:[#allocation0 + $0x68] sm:$0x3] %v285_v18 }
   0xe   :  { %104 = vst [vmem:[#allocation0 + $0x60] sm:$0x3] %v286_v19  ;;  %v287_v20 = vld [vmem:[%s452_s0 + $0x16] sm:$0x3]  ;;  %v288_v21 = vld [vmem:[%s452_s0 + $0x14] sm:$0x3] }
   0xf   :  { %v289_v22 = vld [vmem:[%s452_s0 + $0x12] sm:$0x3]  ;;  %109 = vst [vmem:[#allocation0 + $0x58] sm:$0x3] %v287_v20  ;;  %114 = vst [vmem:[#allocation0 + $0x50] sm:$0x3] %v288_v21 }
  0x10   :  { %119 = vst [vmem:[#allocation0 + $0x48] sm:$0x3] %v289_v22  ;;  %v290_v23 = vld [vmem:[%s452_s0 + $0x10] sm:$0x3]  ;;  %v267_v24 = vld [vmem:[%s452_s0 + $0x3e] sm:$0x3] }
  0x11   :  { %v268_v25 = vld [vmem:[%s452_s0 + $0x3c] sm:$0x3]  ;;  %v197_v26 = vld [vmem:[#allocation0 + $0x1] ss:$8 sm:$0xf0]  }
  0x12   :  { %124 = vst [vmem:[#allocation0 + $0x40] sm:$0x3] %v290_v23  ;;  %9 = vst [vmem:[#allocation0 + $0xf8] sm:$0x3] %v267_v24  ;;  %v269_v27 = vld [vmem:[%s452_s0 + $0x3a] sm:$0x3] }
  0x13   :  { %14 = vst [vmem:[#allocation0 + $0xf0] sm:$0x3] %v268_v25  ;;  %v195_v28 = vld [vmem:[#allocation0 + $0x1] ss:$8 sm:$0xf]  }
  0x14   :  { %19 = vst [vmem:[#allocation0 + $0xe8] sm:$0x3] %v269_v27  ;;  %v270_v29 = vld [vmem:[%s452_s0 + $0x38] sm:$0x3]  ;;  %v199_v30 = vsel %vm163_vm0, %v197_v26, %v195_v28  ;;  %v271_v31 = vld [vmem:[%s452_s0 + $0x36] sm:$0x3] }
  0x15   :  { %24 = vst [vmem:[#allocation0 + $0xe0] sm:$0x3] %v270_v29  ;;  %v272_v32 = vld [vmem:[%s452_s0 + $0x34] sm:$0x3]  ;;  %v273_v33 = vld [vmem:[%s452_s0 + $0x32] sm:$0x3]  ;;  %200 = vrot.lane.b32.xlu0 %v199_v30, %s305_s10 }
  0x16   :  { %v218_v34 = vld [vmem:[#allocation0 + $0x81] ss:$8 sm:$0xf0]   ;;  %29 = vst [vmem:[#allocation0 + $0xd8] sm:$0x3] %v271_v31 }
  0x17   :  { %34 = vst [vmem:[#allocation0 + $0xd0] sm:$0x3] %v272_v32  ;;  %39 = vst [vmem:[#allocation0 + $0xc8] sm:$0x3] %v273_v33  ;;  %v274_v35 = vld [vmem:[%s452_s0 + $0x30] sm:$0x3] }
  0x18   :  { %v216_v36 = vld [vmem:[#allocation0 + $0x81] ss:$8 sm:$0xf]   ;;  %44 = vst [vmem:[#allocation0 + $0xc0] sm:$0x3] %v274_v35 }
  0x19   :  { %v161_v37 = vld [vmem:[#allocation0] ss:$8 sm:$0xf]   ;;  %v220_v38 = vsel %vm163_vm0, %v218_v34, %v216_v36  ;;  %v207_v39 = vld [vmem:[#allocation0 + $0x41] ss:$8 sm:$0xf0]  }
  0x1a   :  { %v162_v40 = vld [vmem:[#allocation0] ss:$8 sm:$0xf0]   ;;  %221 = vrot.lane.b32.xlu1 %v220_v38, %s305_s10  ;;  %v205_v44 = vld [vmem:[#allocation0 + $0x41] ss:$8 sm:$0xf]  }
  0x1b   :  { %v164_v41 = vsel %vm163_vm0, %v162_v40, %v161_v37  ;;  %v177_v42 = vld [vmem:[#allocation0 + $0x80] ss:$8 sm:$0xf]   ;;  %v209_v47 = vsel %vm163_vm0, %v207_v39, %v205_v44 }
  0x1c   :  { %v179_v43 = vld [vmem:[#allocation0 + $0x80] ss:$8 sm:$0xf0]   ;;  %166 = vst.msk [vmem:[%s453_s1] sm:$0xff] %vm165_vm1, %v164_v41   ;;  %210 = vrot.lane.b32.xlu0 %v209_v47, %s305_s10 }
  0x1d   :  { %v181_v45 = vsel %vm163_vm0, %v179_v43, %v177_v42  ;;  %v168_v46 = vld [vmem:[#allocation0 + $0x40] ss:$8 sm:$0xf]   ;;  %v229_v49 = vld [vmem:[#allocation0 + $0xc1] ss:$8 sm:$0xf0]  }
  0x1e   :  { %299 = vst.msk [vmem:[%s453_s1 + $0x10] sm:$0xff] %vm165_vm1, %v181_v45   ;;  %v170_v48 = vld [vmem:[#allocation0 + $0x40] ss:$8 sm:$0xf0]  }
  0x1f   :  { %v172_v50 = vsel %vm163_vm0, %v170_v48, %v168_v46  ;;  %v188_v51 = vld [vmem:[#allocation0 + $0xc0] ss:$8 sm:$0xf0]   ;;  %v227_v52 = vld [vmem:[#allocation0 + $0xc1] ss:$8 sm:$0xf]  }
  0x20   :  { %298 = vst.msk [vmem:[%s453_s1 + $0x8] sm:$0xff] %vm165_vm1, %v172_v50   ;;  %v186_v53 = vld [vmem:[#allocation0 + $0xc0] ss:$8 sm:$0xf]   ;;  %v231_v54 = vsel %vm163_vm0, %v229_v49, %v227_v52 }
  0x21   :  { %v190_v55 = vsel %vm163_vm0, %v188_v51, %v186_v53  ;;  %232 = vrot.lane.b32.xlu1 %v231_v54, %s305_s10 }
  0x22   :  { %300 = vst.msk [vmem:[%s453_s1 + $0x18] sm:$0xff] %vm165_vm1, %v190_v55  }
  0x87   :  { %v201_v56 = vpop.permute.xlu0 %200  }
  0x88   :  { %203 = vst.msk [vmem:[%s453_s1] sm:$0xff] %vm202_vm2, %v201_v56  }
  0x8c   :  { %v222_v57 = vpop.permute.xlu1 %221  }
  0x8d   :  { %302 = vst.msk [vmem:[%s453_s1 + $0x10] sm:$0xff] %vm202_vm2, %v222_v57  }
  0x8e   :  { %v211_v58 = vpop.permute.xlu0 %210  }
  0x8f   :  { %301 = vst.msk [vmem:[%s453_s1 + $0x8] sm:$0xff] %vm202_vm2, %v211_v58  }
  0x93   :  { %v233_v59 = vpop.permute.xlu1 %232  }
  0x94   :  { %303 = vst.msk [vmem:[%s453_s1 + $0x18] sm:$0xff] %vm202_vm2, %v233_v59  }

// kernel: _filter_layer_impl.1
= control target key start
LH: loop header
LB: loop body
LE: loop exit
PB: predicated region body
PF: predicated region fallthrough
CT: control target
= control target key end

     0   :  { %vm44_vm0 = vcmask 1043456   ;;  %vm37_vm1 = vcmask 64512   ;;  %v199_v5 = vmov 0.0   ;;  %vm200_vm2 = vmmov 0   ;;  %s270_s0 = inlined_call_operand.vmem [shape: f32[8,128], index: 0, kind: input, shape index: {}]   ;;  %s271_s1 = inlined_call_operand.vmem [shape: bf16[32,8], index: 1, kind: input, shape index: {}]   ;;  %s272_s3 = inlined_call_operand.vmem [shape: f32[32,128], index: 3, kind: input, shape index: {}]   ;;  %s273_s4 = inlined_call_operand.vmem [shape: f32[32,128], index: 4, kind: input, shape index: {}]   ;;  %s274_s2 = inlined_call_operand.vmem [shape: bf16[8,32], index: 2, kind: input, shape index: {}]   ;;  %s275_s5 = inlined_call_operand.vmem [shape: f32[8,128], index: 5, kind: output, shape index: {}]  }
   0x1   :  { %v21_v0 = vld [vmem:[%s270_s0] sm:$0xff]  ;;  %v198_v4 = vld [vmem:[%s271_s1 + $0x8] sm:$0xff]   ;;  %186 = vmatprep.subr.bf16.mxu1 %v199_v5  ;;  %190 = vmatprep.mubr.msk.bf16.mxu1 %vm200_vm2, %v199_v5  ;;  %v107_v8 = vld [vmem:[%s273_s4 + $0x10] sm:$0xff]  ;;  %vm120_vm3 = vcmask 261120  }
   0x2   :  { %v22_v1 = vpack.c.bf16 %v21_v0, %v21_v0  ;;  %v197_v2 = vld [vmem:[%s271_s1] sm:$0xff]   ;;  %v99_v9 = vld [vmem:[%s272_s3 + $0x10] sm:$0xff]  ;;  %v100_v11 = vld [vmem:[%s272_s3 + $0x18] sm:$0xff] }
   0x3   :  { %182 = vmatprep.mubr.msk.bf16.mxu0 %vm37_vm1, %v197_v2  ;;  %v98_v12 = vld [vmem:[%s272_s3 + $0x8] sm:$0xff]  ;;  %v108_v13 = vld [vmem:[%s273_s4 + $0x18] sm:$0xff]  ;;  %v97_v15 = vld [vmem:[%s272_s3] sm:$0xff] }
   0x4   :  { %194 = vmatprep.subr.msk.bf16.mxu0 %vm44_vm0, %v22_v1  ;;  %v46_v3 = vsel %vm44_vm0, %v22_v1, 0  ;;  %v106_v16 = vld [vmem:[%s273_s4 + $0x8] sm:$0xff]  ;;  %v105_v22 = vld [vmem:[%s273_s4] sm:$0xff] }
   0x5   :  { %181 = vmatpush3.bf16.msra.mxu0 %v46_v3  ;;  %v117_v32 = vld [vmem:[%s274_s2] sm:$0xf] }
   0x8   :  { %183 = vmatmul.mubr.msk.bf16.vlgmr.msra.gmra.mxu0 %vm37_vm1, %v198_v4 }
  0xc8   :  { %v184_v6 = vpop.f32.mrf.mxu0 }
  0xc9   :  { %v103_v18 = vmul.f32 %v184_v6, %v99_v9  ;;  %v109_v27 = vmul.f32 %v184_v6, %v105_v22 }
  0xca   :  { %v82_v7 = vpop.f32.mrf.mxu0 }
  0xcb   :  { %v111_v14 = vmul.f32 %v107_v8, %v82_v7  ;;  %v101_v23 = vmul.f32 %v97_v15, %v82_v7 }
  0xcc   :  { %v185_v10 = vpop.f32.mrf.mxu0 }
  0xcd   :  { %v104_v19 = vmul.f32 %v185_v10, %v100_v11  ;;  %v110_v24 = vmul.f32 %v185_v10, %v106_v16  ;;  %v115_v26 = vadd.f32 %v111_v14, %v103_v18  ;;  %v113_v30 = vadd.f32 %v109_v27, %v101_v23 }
  0xce   :  { %v85_v17 = vpop.f32.mrf.mxu0 }
  0xcf   :  { %v102_v20 = vmul.f32 %v98_v12, %v85_v17  ;;  %v112_v21 = vmul.f32 %v108_v13, %v85_v17 }
  0xd1   :  { %v116_v25 = vadd.f32 %v112_v21, %v104_v19  ;;  %v114_v28 = vadd.f32 %v110_v24, %v102_v20 }
  0xd3   :  { %v119_v29 = vpack.c.bf16 %v116_v25, %v115_v26  ;;  %v118_v31 = vpack.c.bf16 %v114_v28, %v113_v30 }
  0xd5   :  { %187 = vmatpush3.bf16.msra.mxu1 %v119_v29 }
  0xd6   :  { %188 = vmatprep.subr.bf16.mxu1 %v199_v5 }
  0xd9   :  { %189 = vmatpush3.bf16.msra.mxu1 %v118_v31 }
  0xdc   :  { %191 = vmatmul.mubr.msk.bf16.vlgmr.msra.gmra.mxu1 %vm120_vm3, %v117_v32 }
 0x19c   :  { %v158_v33 = vpop.f32.mrf.mxu1 }
 0x19d   :  { %164 = vst [vmem:[%s275_s5] sm:$0xff] %v158_v33 }
 0x19e   :  { %v192_v34 = vpop.f32.mrf.mxu1 }
 0x1a0   :  { %v161_v35 = vpop.f32.mrf.mxu1 }
 0x1a2   :  { %v193_v36 = vpop.f32.mrf.mxu1 }

</bundles_post_ra>
